<compile_context>
chip_gen: v5e
topology: v5e:2x2
jax: 0.10.0
libtpu: 0.0.40
codegen_flags: <defaults>
</compile_context>

<pallas_src>
import functools

import jax
import jax.numpy as jnp
from jax.experimental import pallas as pl
from jax.experimental.pallas import tpu as pltpu


# ---------------------------------------------------------------------------
# Helpers
# ---------------------------------------------------------------------------
def _round_up(n: int, m: int) -> int:
    return ((n + m - 1) // m) * m


def _cdiv(a: int, b: int) -> int:
    return -(-a // b)


def _vmem_limit_bytes() -> int:
    """Generation-aware VMEM budget: ~3/4 of physical capacity.

    ~96 MiB on v5e/v6e (128 MiB physical), ~48 MiB on v7x (64 MiB physical).
    Falls back to a conservative 48 MiB if the query is unavailable.
    """
    cap = None
    try:
        cap = getattr(pltpu.get_tpu_info(), "vmem_capacity_bytes", None)
    except Exception:
        cap = None
    if not cap:
        cap = 64 * 1024 * 1024
    return int(min(cap * 3 // 4, 110 * 1024 * 1024))


def _choose_batch_tiling(B, E, itemsize, block_rows, vmem_limit):
    """Pick (row_tile, n_row_tiles) for the batch axis."""
    B8 = _round_up(max(B, 1), 8)
    if block_rows is None:
        # Aim for >= ~2 MiB x/out tiles so DMAs are large and the ~0.35 us
        # per-grid-step overhead amortizes (matters most at small E).
        block_rows = max(512, (2 << 20) // max(1, E * itemsize))
    # Keep double-buffered x tiles well under the VMEM budget for large E.
    cap = max(8, (vmem_limit // 8) // max(1, E * itemsize))
    block_rows = max(8, min(block_rows, 4096, cap))

    tb = min(_round_up(block_rows, 8), B8)
    n = _cdiv(B8, tb)
    if n == 1 and B8 >= 16:
        n = 2  # >= 2 row tiles so v7x's second TensorCore has work to steal.
    # Balance tiles so batch padding never exceeds the sublane round-up.
    tb = _round_up(_cdiv(B8, n), 8)
    n = _cdiv(B8, tb)
    return tb, n


def choose_col_tile(E, itemsize, vmem_limit=None):
    """Output-column tile: E (whole fused weight resident) when it fits
    ~1/3 of the VMEM budget, otherwise the largest 128-multiple divisor of E
    whose streamed (E, 2*tile) weight blocks fit (double-buffered)."""
    if vmem_limit is None:
        vmem_limit = _vmem_limit_bytes()
    budget = max(1, vmem_limit // 3)
    if 2 * E * E * itemsize <= budget or E % 128 != 0:
        return E
    m = E // 128
    for d in range(m, 0, -1):
        if m % d == 0 and 4 * E * 128 * d * itemsize <= budget:
            return 128 * d
    return 128


# ---------------------------------------------------------------------------
# One-time parameter preparation (hoisted out of the forward pass)
# ---------------------------------------------------------------------------
def prepare_highway_params(w_proj, b_proj, w_gate, b_gate, *,
                           col_tile=None, param_dtype=None):
    """Transpose to (in, out) layout, optionally cast, and fuse proj/gate into
    a single (E, 2E) RHS.  If col_tile < E, the proj/gate columns are
    interleaved per column tile so each grid step does one fused MXU matmul.
    Call once and reuse the result across forward calls."""
    E = w_proj.shape[0]
    tn = E if col_tile is None else int(col_tile)
    assert E % tn == 0, "col_tile must divide the embedding size"
    n_col = E // tn
    dt = w_proj.dtype if param_dtype is None else param_dtype

    wp = jnp.asarray(w_proj).T.astype(dt).reshape(E, n_col, tn)
    wg = jnp.asarray(w_gate).T.astype(dt).reshape(E, n_col, tn)
    w_cat = jnp.concatenate([wp, wg], axis=-1).reshape(E, 2 * E)

    bp = jnp.asarray(b_proj).reshape(-1).astype(jnp.float32).reshape(n_col, tn)
    bg = jnp.asarray(b_gate).reshape(-1).astype(jnp.float32).reshape(n_col, tn)
    b_cat = jnp.concatenate([bp, bg], axis=-1).reshape(1, 2 * E)
    return w_cat, b_cat


# ---------------------------------------------------------------------------
# Kernel
# ---------------------------------------------------------------------------
def highway_kernel(x_ref, w_ref, b_ref, out_ref, *, bf16_mxu=False):
    # x_ref:  (TB, E)      input dtype
    # w_ref:  (E, 2*TN)    fused [proj | gate] columns for this column tile
    # b_ref:  (1, 2*TN)    f32
    # out_ref:(TB, TN)
    tn = out_ref.shape[-1]
    x = x_ref[...]
    xm = x.astype(jnp.bfloat16) if bf16_mxu else x

    # Single fused matmul on the MXU per grid step, f32 accumulation.
    y = jnp.dot(xm, w_ref[...], preferred_element_type=jnp.float32) + b_ref[...]

    proj = jnp.maximum(y[:, :tn], 0.0)          # ReLU     (VPU)
    gate = jax.nn.sigmoid(y[:, tn:])            # Sigmoid  (EUP)

    if tn == x_ref.shape[-1]:
        xc = x.astype(jnp.float32)              # single-column-tile fast path
    else:
        col = pl.multiple_of(pl.program_id(1) * tn, 128)
        xc = x_ref[:, pl.ds(col, tn)].astype(jnp.float32)

    # x + gate * (proj - x)  ==  gate*proj + (1-gate)*x   (one fewer multiply)
    out_ref[...] = (xc + gate * (proj - xc)).astype(out_ref.dtype)


# ---------------------------------------------------------------------------
# Forward wrapper
# ---------------------------------------------------------------------------
@functools.partial(jax.jit, static_argnames=("col_tile", "block_rows", "bf16_mxu"))
def highway_forward(x, w_cat, b_cat, *, col_tile=None, block_rows=None,
                    bf16_mxu=False):
    B, E = x.shape
    assert w_cat.shape == (E, 2 * E), "use prepare_highway_params() first"
    assert b_cat.shape == (1, 2 * E)

    tn = E if col_tile is None else int(col_tile)
    assert E % tn == 0
    assert tn == E or tn % 128 == 0, "col_tile must be E or a multiple of 128"
    n_col = E // tn

    vmem_limit = _vmem_limit_bytes()
    itemsize = jnp.dtype(x.dtype).itemsize
    tb, n_row = _choose_batch_tiling(B, E, itemsize, block_rows, vmem_limit)
    Bp = tb * n_row

    # Only pad the batch when needed; never pad / slice the embedding dim.
    x_p = x if Bp == B else jnp.zeros((Bp, E), x.dtype).at[:B].set(x)

    if n_col == 1:
        # Fused weight/bias stay fully resident in VMEM: constant block index
        # plus single buffering (double-buffering them only wastes VMEM).
        w_spec = pl.BlockSpec((E, 2 * E), lambda i, j: (0, 0),
                              pipeline_mode=pl.Buffered(1))
        b_spec = pl.BlockSpec((1, 2 * E), lambda i, j: (0, 0),
                              pipeline_mode=pl.Buffered(1))
    else:
        # Large-E path: stream (E, 2*TN) weight column tiles per grid step.
        w_spec = pl.BlockSpec((E, 2 * tn), lambda i, j: (0, j))
        b_spec = pl.BlockSpec((1, 2 * tn), lambda i, j: (0, j))

    out = pl.pallas_call(
        functools.partial(highway_kernel, bf16_mxu=bf16_mxu),
        out_shape=jax.ShapeDtypeStruct((Bp, E), x.dtype),
        grid_spec=pltpu.PrefetchScalarGridSpec(
            num_scalar_prefetch=0,
            grid=(n_row, n_col),
            in_specs=[
                # x row tile: pipelined along the batch axis, resident across
                # the (inner) column axis.
                pl.BlockSpec((tb, E), lambda i, j: (i, 0)),
                w_spec,
                b_spec,
            ],
            out_specs=pl.BlockSpec((tb, tn), lambda i, j: (i, j)),
        ),
        compiler_params=pltpu.CompilerParams(
            dimension_semantics=("parallel", "arbitrary"),
            vmem_limit_bytes=vmem_limit,
        ),
    )(x_p, w_cat, b_cat)

    return out if Bp == B else out[:B]


# ---------------------------------------------------------------------------
# Pure-JAX reference (f32 math, matches the PyTorch module in eval mode)
# ---------------------------------------------------------------------------
def highway_reference(x, w_proj, b_proj, w_gate, b_gate):
    x32 = x.astype(jnp.float32)
    proj = jnp.maximum(
        x32 @ w_proj.T.astype(jnp.float32) + b_proj.reshape(-1).astype(jnp.float32), 0.0)
    gate = jax.nn.sigmoid(
        x32 @ w_gate.T.astype(jnp.float32) + b_gate.reshape(-1).astype(jnp.float32))
    return (gate * proj + (1.0 - gate) * x32).astype(x.dtype)


if __name__ == "__main__":
    key = jax.random.PRNGKey(0)
    keys = jax.random.split(key, 10)
    f32_itemsize = jnp.dtype(jnp.float32).itemsize

    # --- Test 1: assignment-sized shapes (word_embed_size = 32) -------------
    batch, embed = 8, 32
    bound = 1.0 / (embed ** 0.5)
    x = jax.random.normal(keys[0], (batch, embed), jnp.float32)
    w_proj = jax.random.uniform(keys[1], (embed, embed), jnp.float32, -bound, bound)
    b_proj = jax.random.uniform(keys[2], (embed,), jnp.float32, -bound, bound)
    w_gate = jax.random.uniform(keys[3], (embed, embed), jnp.float32, -bound, bound)
    b_gate = jax.random.uniform(keys[4], (embed,), jnp.float32, -bound, bound)

    tn = choose_col_tile(embed, f32_itemsize)          # -> 32 (fully resident)
    w_cat, b_cat = prepare_highway_params(w_proj, b_proj, w_gate, b_gate,
                                          col_tile=tn)
    out = jax.block_until_ready(highway_forward(x, w_cat, b_cat, col_tile=tn))
    ref = highway_reference(x, w_proj, b_proj, w_gate, b_gate)
    assert out.shape == (batch, embed)
    assert jnp.allclose(out, ref, atol=1e-4, rtol=1e-4), "mismatch vs reference (E=32)"

    # --- Test 2: exercise the column-tiled (streamed-weight) path -----------
    batch2, embed2, tile2 = 24, 256, 128
    bound2 = 1.0 / (embed2 ** 0.5)
    x2 = jax.random.normal(keys[5], (batch2, embed2), jnp.float32)
    w_proj2 = jax.random.uniform(keys[6], (embed2, embed2), jnp.float32, -bound2, bound2)
    b_proj2 = jax.random.uniform(keys[7], (embed2,), jnp.float32, -bound2, bound2)
    w_gate2 = jax.random.uniform(keys[8], (embed2, embed2), jnp.float32, -bound2, bound2)
    b_gate2 = jax.random.uniform(keys[9], (embed2,), jnp.float32, -bound2, bound2)

    w_cat2, b_cat2 = prepare_highway_params(w_proj2, b_proj2, w_gate2, b_gate2,
                                            col_tile=tile2)
    out2 = jax.block_until_ready(
        highway_forward(x2, w_cat2, b_cat2, col_tile=tile2))
    ref2 = highway_reference(x2, w_proj2, b_proj2, w_gate2, b_gate2)
    assert out2.shape == (batch2, embed2)
    # Looser tolerance for the longer K=256 accumulation.
    assert jnp.allclose(out2, ref2, atol=1e-3, rtol=1e-3), "mismatch vs reference (E=256)"

    print("KERNEL_OK")
</pallas_src>

<mosaic_0001>
module attributes {stable_mosaic.version = 11 : i64} {
  func.func @highway_kernel(%arg0: i32, %arg1: i32, %arg2: memref<8x32xf32, #tpu.memory_space<vmem>>, %arg3: memref<32x64xf32, #tpu.memory_space<vmem>>, %arg4: memref<1x64xf32, #tpu.memory_space<vmem>>, %arg5: memref<8x32xf32, #tpu.memory_space<vmem>>) attributes {dimension_semantics = [#tpu.dimension_semantics<parallel>, #tpu.dimension_semantics<arbitrary>], iteration_bounds = array<i64: 1, 1>, scalar_prefetch = 0 : i64, scratch_operands = 0 : i64, tpu.core_type = #tpu.core_type<tc>, window_params = [{transform_indices = @transform_0, window_bounds = array<i64: 8, 32>}, {pipeline_mode = #tpu.pipeline_mode<synchronous>, transform_indices = @transform_1, window_bounds = array<i64: 32, 64>}, {pipeline_mode = #tpu.pipeline_mode<synchronous>, transform_indices = @transform_2, window_bounds = array<i64: 1, 64>}, {transform_indices = @transform_3, window_bounds = array<i64: 8, 32>}]} {
    %c0 = arith.constant 0 : index
    %c0_0 = arith.constant 0 : index
    %0 = vector.load %arg2[%c0, %c0_0] : memref<8x32xf32, #tpu.memory_space<vmem>>, vector<8x32xf32>
    %c0_1 = arith.constant 0 : index
    %c0_2 = arith.constant 0 : index
    %1 = vector.load %arg3[%c0_1, %c0_2] : memref<32x64xf32, #tpu.memory_space<vmem>>, vector<32x64xf32>
    %cst = arith.constant dense<0.000000e+00> : vector<8x64xf32>
    %2 = tpu.matmul %0, %1, %cst {dimension_numbers = #tpu.dot_dimension_numbers<[1], [0], [0], [1], [0, 0, 1, 1], [], []>} : vector<8x32xf32>, vector<32x64xf32>, vector<8x64xf32> -> vector<8x64xf32>
    %c0_3 = arith.constant 0 : index
    %c0_4 = arith.constant 0 : index
    %3 = vector.load %arg4[%c0_3, %c0_4] : memref<1x64xf32, #tpu.memory_space<vmem>>, vector<1x64xf32>
    %4 = vector.broadcast %3 : vector<1x64xf32> to vector<8x64xf32>
    %5 = arith.addf %2, %4 : vector<8x64xf32>
    %6 = vector.extract_strided_slice %5 {offsets = [0, 0], sizes = [8, 32], strides = [1, 1]} : vector<8x64xf32> to vector<8x32xf32>
    %cst_5 = arith.constant 0.000000e+00 : f32
    %7 = vector.broadcast %cst_5 : f32 to vector<8x32xf32>
    %8 = arith.maximumf %6, %7 : vector<8x32xf32>
    %9 = vector.extract_strided_slice %5 {offsets = [0, 32], sizes = [8, 32], strides = [1, 1]} : vector<8x64xf32> to vector<8x32xf32>
    %10 = arith.negf %9 : vector<8x32xf32>
    %11 = math.exp %10 : vector<8x32xf32>
    %cst_6 = arith.constant 1.000000e+00 : f32
    %12 = vector.broadcast %cst_6 : f32 to vector<8x32xf32>
    %13 = arith.addf %12, %11 : vector<8x32xf32>
    %14 = arith.divf %12, %13 : vector<8x32xf32>
    %15 = arith.subf %8, %0 : vector<8x32xf32>
    %16 = arith.mulf %14, %15 : vector<8x32xf32>
    %17 = arith.addf %0, %16 : vector<8x32xf32>
    %c0_7 = arith.constant 0 : index
    %c0_8 = arith.constant 0 : index
    %18 = vector.load %arg5[%c0_7, %c0_8] : memref<8x32xf32, #tpu.memory_space<vmem>>, vector<8x32xf32>
    tpu.vector_store %arg5[%c0_7, %c0_8], %17 {strides = array<i32>} : memref<8x32xf32, #tpu.memory_space<vmem>>, vector<8x32xf32>,
    return
  }
  func.func @transform_0(%arg0: i32, %arg1: i32) -> (i32, i32) {
    %c0_i32 = arith.constant 0 : i32
    %c0_i32_0 = arith.constant 0 : i32
    return %arg0, %c0_i32 : i32, i32
  }
  func.func @transform_1(%arg0: i32, %arg1: i32) -> (i32, i32) {
    %c0_i32 = arith.constant 0 : i32
    %c0_i32_0 = arith.constant 0 : i32
    %c0_i32_1 = arith.constant 0 : i32
    return %c0_i32, %c0_i32_0 : i32, i32
  }
  func.func @transform_2(%arg0: i32, %arg1: i32) -> (i32, i32) {
    %c0_i32 = arith.constant 0 : i32
    %c0_i32_0 = arith.constant 0 : i32
    %c0_i32_1 = arith.constant 0 : i32
    return %c0_i32, %c0_i32_0 : i32, i32
  }
  func.func @transform_3(%arg0: i32, %arg1: i32) -> (i32, i32) {
    %c0_i32 = arith.constant 0 : i32
    return %arg0, %arg1 : i32, i32
  }
}

</mosaic_0001>

<bundles_post_ra>
// kernel: highway_forward.1
= control target key start
LH: loop header
LB: loop body
LE: loop exit
PB: predicated region body
PF: predicated region fallthrough
CT: control target
= control target key end

     0   :  { %8 = vsyncpa [#allocation3], 0  ;;  %s261_s0 = inlined_call_operand.hbm [shape: f32[8,32], index: 0, kind: input, shape index: {}]   ;;  %s262_s1 = inlined_call_operand.hbm [shape: f32[32,64], index: 1, kind: input, shape index: {}]   ;;  %s263_s2 = inlined_call_operand.vmem [shape: f32[1,64], index: 2, kind: input, shape index: {}]   ;;  %s264_s3 = inlined_call_operand.hbm [shape: f32[8,32], index: 3, kind: output, shape index: {}]  }
   0x1   :  { %9 = vsyncpa [#allocation6], 0 }
   0x2   :  { %10 = vsyncpa [#allocation4], 0  ;;  %s16_s14 = sshll.u32 %s261_s0, 4  ;;  %s220_s15 = smov [#allocation2]   ;;  %s17_s14 = int_to_ptr.hbm [resolvable:$true] %s16_s14 }
   0x3   :  { %s18_s16 = sshll.u32 %s220_s15, 4  ;;  %s26_s19 = sshll.u32 %s262_s1, 4  ;;  %s19_s16 = int_to_ptr.vmem [resolvable:$true] %s18_s16  ;;  %s27_s19 = int_to_ptr.hbm [resolvable:$true] %s26_s19 }
   0x4   :  { %21 = dma.hbm_to_vmem [thread:$0]  %s17_s14, 128, %s19_s16, [#allocation3]  }
   0x5   :  { %s221_s20 = smov [#allocation5]   ;;  %s222_s22 = smov 128  }
   0x6   :  { %s28_s21 = sshll.u32 %s221_s20, 4  ;;  %s223_s23 = smov 8   ;;  %s29_s21 = int_to_ptr.vmem [resolvable:$true] %s28_s21 }
   0x7   :  { %34 = dma.hbm_to_vmem [thread:$0]  %s27_s19, 512, %s29_s21, [#allocation6], %s222_s22, %s222_s22, %s223_s23  }
   0x8   :  { %214 = dma.done.wait [#allocation3], 128  }
   0x9   :  { %215 = vsyncadd [#allocation3], 4294967168 }
   0xa   :  { %216 = dma.done.wait [#allocation6], 512  }
   0xb   :  { %217 = vsyncadd [#allocation6], 4294966784  ;;  %v49_v0 = vld [vmem:[#allocation5 + $0x18] sm:$0xff]  ;;  %v48_v1 = vld [vmem:[#allocation5 + $0x10] sm:$0xff]  ;;  %vm54_vm0 = vcmask 261120   ;;  %s224_s24 = smov 32  }
   0xc   :  { %70 = vmatpush.msra.mxu0 %v49_v0  ;;  %v47_v2 = vld [vmem:[#allocation5 + $0x8] sm:$0xff]  ;;  %v46_v3 = vld [vmem:[#allocation5] sm:$0xff]  ;;  %v45_v4 = vld [vmem:[#allocation2] sm:$0xff]  ;;  %s226_s25 = smov [#allocation7]   ;;  %s117_s29 = sshll.u32 %s264_s3, 4  ;;  %s118_s29 = int_to_ptr.hbm [resolvable:$true] %s117_s29 }
   0xd   :  { %v137_v5 = vld [vmem:[%s263_s2] ss:$0 sm:$0xff]  ;;  %s225_s2 = smov 96   ;;  %s115_s26 = sshll.u32 %s226_s25, 4  ;;  %s116_s26 = int_to_ptr.vmem [resolvable:$true] %s115_s26 }
   0xe   :  { %71 = vmatpush.msra.mxu0 %v48_v1 }
  0x10   :  { %72 = vmatpush.msra.mxu0 %v47_v2 }
  0x12   :  { %73 = vmatpush.msra.mxu0 %v46_v3 }
  0x13   :  { %128 = vmatmul.msk.f32.vlgmr.msra.gmra.mxu0 %vm54_vm0, %v45_v4 }
  0x90   :  { %v75_v6 = vpop.f32.mrf.mxu0 }
  0x91   :  { %v76_v7 = vadd.f32 %v137_v5, %v75_v6 }
  0x93   :  { %v78_v8 = vmax.f32 %v76_v7, 0.0  ;;  %v129_v10 = vmul.f32 -1.442695, %v76_v7 }
  0x95   :  { %v98_v9 = vsub.f32 %v78_v8, %v45_v4  ;;  %138 = vpow2.f32 %v129_v10 }
  0x97   :  { %100 = vrot.lane.b32.xlu0 %v98_v9, %s224_s24 }
  0x9b   :  { %v139_v11 = vpop.eup %138 }
  0x9c   :  { %v82_v12 = vadd.f32 1.0, %v139_v11 }
  0x9e   :  { %140 = vrcp.f32 %v82_v12  ;;  %v94_v18 = vand.u32 2147483648, %v82_v12  ;;  %vm88_vm2 = vweird.f32 %v82_v12  ;;  %v92_v19 = vand.u32 2147483647, %v82_v12 }
  0xa0   :  { %v95_v21 = vor.u32 1.1754944e-38, %v94_v18  ;;  %vm93_vm4 = vcmp.eq.f32.partialorder %v92_v19, 8.507059e+37 }
  0xa4   :  { %v141_v13 = vpop.eup %140 }
  0xa5   :  { %v84_v14 = vmul.f32 %v141_v13, %v82_v12  ;;  %vm89_vm1 = vweird.f32 %v141_v13 }
  0xa6   :  { %vm90_vm3 = vmor %vm88_vm2, %vm89_vm1 }
  0xa7   :  { %v85_v15 = vsub.f32 1.0, %v84_v14 }
  0xa9   :  { %v86_v16 = vmul.f32 %v141_v13, %v85_v15 }
  0xab   :  { %v87_v17 = vadd.f32 %v141_v13, %v86_v16 }
  0xad   :  { %v91_v20 = vsel %vm90_vm3, %v141_v13, %v87_v17 }
  0xae   :  { %v96_v22 = vsel %vm93_vm4, %v95_v21, %v91_v20 }
 0x109   :  { %v101_v23 = vpop.permute.xlu0 %100 }
 0x10a   :  { %v103_v24 = vmul.f32 %v101_v23, %v96_v22 }
 0x10c   :  { %105 = vrot.lane.b32.xlu0 %v103_v24, %s225_s2 }
 0x17e   :  { %v106_v25 = vpop.permute.xlu0 %105 }
 0x17f   :  { %v108_v26 = vadd.f32 %v106_v25, %v45_v4 }
 0x181   :  { %109 = vst.msk [vmem:[#allocation7] sm:$0xff] %vm54_vm0, %v108_v26 }
 0x182   :  { %120 = dma.vmem_to_hbm [thread:$0]  %s116_s26, 128, %s118_s29, [#allocation4]  }
 0x183   :  { %218 = dma.done.wait [#allocation4], 128  }
 0x184   :  { %219 = vsyncadd [#allocation4], 4294967168 }
 0x185   :  { %125 = vsyncpa [#allocation3], 1 }
 0x186   :  { %126 = vsyncpa [#allocation6], 1 }
 0x187   :  { %127 = vsyncpa [#allocation4], 1 }

</bundles_post_ra>
